<compile_context>
chip_gen: v5e
topology: v5e:2x2
jax: 0.10.0
libtpu: 0.0.40
codegen_flags: <defaults>
</compile_context>

<pallas_src>
import jax
import jax.numpy as jnp
from jax.experimental import pallas as pl
from jax.experimental.pallas import tpu as pltpu

W_STEERING = 7.0  # module __init__ default
W_SPEED = 1.0     # module __init__ default


def _round_up(x, m):
    return (x + m - 1) // m * m


def _loss_kernel(out_ref, tgt_ref, acc_ref):
    """Blocks are (block_rows, L) views of the row-major-flattened (N, 2) arrays.

    Flat layout is [s0, v0, s1, v1, ...]; since L is even, even lanes hold
    steering and odd lanes hold speed. acc_ref is this core's (1, 8, L)
    resident output block of weighted partial sums.
    """
    k = pl.program_id(1)

    @pl.when(k == 0)
    def _():
        acc_ref[...] = jnp.zeros_like(acc_ref)

    o = out_ref[...].astype(jnp.float32)
    t = tgt_ref[...].astype(jnp.float32)
    diff = o - t
    abs_d = jnp.abs(diff)
    sq = diff * diff                                  # MSE term (reused by SmoothL1)
    # SmoothL1 (beta = 1.0): 0.5*d^2 if |d| < 1 else |d| - 0.5
    sl1 = jnp.where(abs_d < 1.0, 0.5 * sq, abs_d - 0.5)

    lane = jax.lax.broadcasted_iota(jnp.int32, diff.shape, 1)
    weighted = jnp.where((lane & 1) == 0, W_STEERING * sl1, W_SPEED * sq)

    # Fold (block_rows, L) -> (8, L): sublane-preserving reshape + VALU adds,
    # then accumulate into the resident output block.
    br, lanes = weighted.shape
    part = weighted.reshape(br // 8, 8, lanes).sum(axis=0)
    acc_ref[...] += part[None, :, :]


def manual_multitask_loss(outputs, targets, *, lane_width=512, max_block_rows=1024,
                          n_par=2):
    """outputs, targets: (N, 2) arrays (f32 or bf16). Returns scalar f32 loss."""
    assert outputs.shape == targets.shape and outputs.shape[-1] == 2
    n = outputs.shape[0]

    # Free row-major flatten: [steer_0, speed_0, steer_1, speed_1, ...]
    out_flat = outputs.reshape(-1)
    tgt_flat = targets.reshape(-1)
    flat_len = out_flat.shape[0]                      # == 2 * n

    L = _round_up(lane_width, 128)                    # multiple of 128 (=> even)
    rows_needed = pl.cdiv(flat_len, L)
    block_rows = min(_round_up(max_block_rows, 8),
                     _round_up(pl.cdiv(rows_needed, n_par), 8))
    rows_total = _round_up(rows_needed, block_rows * n_par)
    k_steps = rows_total // (block_rows * n_par)

    pad = rows_total * L - flat_len
    if pad:
        # zero padding contributes exactly 0 to both SmoothL1 and MSE sums
        out_flat = jnp.pad(out_flat, (0, pad))
        tgt_flat = jnp.pad(tgt_flat, (0, pad))
    out2d = out_flat.reshape(rows_total, L)
    tgt2d = tgt_flat.reshape(rows_total, L)

    itemsize = jnp.dtype(out2d.dtype).itemsize
    cost = pl.CostEstimate(
        flops=8 * flat_len,
        transcendentals=0,
        bytes_accessed=2 * rows_total * L * itemsize + n_par * 8 * L * 4,
    )

    partials = pl.pallas_call(
        _loss_kernel,
        out_shape=jax.ShapeDtypeStruct((n_par, 8, L), jnp.float32),
        grid_spec=pltpu.PrefetchScalarGridSpec(
            num_scalar_prefetch=0,
            grid=(n_par, k_steps),
            in_specs=[
                pl.BlockSpec((block_rows, L), lambda p, k: (p * k_steps + k, 0)),
                pl.BlockSpec((block_rows, L), lambda p, k: (p * k_steps + k, 0)),
            ],
            out_specs=pl.BlockSpec((1, 8, L), lambda p, k: (p, 0, 0)),
        ),
        compiler_params=pltpu.CompilerParams(
            dimension_semantics=("parallel", "arbitrary"),
        ),
        cost_estimate=cost,
    )(out2d, tgt2d)

    # Combine per-core partial sums and divide by the true batch size.
    return jnp.sum(partials) / n


def _reference_loss(outputs, targets):
    diff = outputs.astype(jnp.float32) - targets.astype(jnp.float32)
    d_steer = diff[:, 0]
    d_speed = diff[:, 1]
    abs_d = jnp.abs(d_steer)
    sl1 = jnp.where(abs_d < 1.0, 0.5 * d_steer * d_steer, abs_d - 0.5)
    return W_STEERING * jnp.mean(sl1) + W_SPEED * jnp.mean(d_speed * d_speed)


if __name__ == "__main__":
    key = jax.random.PRNGKey(0)
    k1, k2, k3, k4 = jax.random.split(key, 4)

    # small case: batch=8 -> one (8, 512) block per core, grid=(2, 1)
    out_s = jax.random.normal(k1, (8, 2), dtype=jnp.float32)
    tgt_s = jax.random.normal(k2, (8, 2), dtype=jnp.float32)
    loss_s = manual_multitask_loss(out_s, tgt_s)
    jax.block_until_ready(loss_s)
    ref_s = _reference_loss(out_s, tgt_s)
    assert jnp.allclose(loss_s, ref_s, rtol=1e-5, atol=1e-6), (loss_s, ref_s)

    # multi-step case: batch=1500 with small blocks -> grid=(2, 2); exercises the
    # resident accumulator across steps, the two-core split, both SmoothL1
    # branches, the lane-parity select, and zero-padding of the tail.
    out_l = jax.random.normal(k3, (1500, 2), dtype=jnp.float32) * 2.0
    tgt_l = jax.random.normal(k4, (1500, 2), dtype=jnp.float32) * 2.0
    loss_l = manual_multitask_loss(out_l, tgt_l, lane_width=128, max_block_rows=8)
    jax.block_until_ready(loss_l)
    ref_l = _reference_loss(out_l, tgt_l)
    assert jnp.allclose(loss_l, ref_l, rtol=1e-5, atol=1e-6), (loss_l, ref_l)

    # bf16 inputs: upcast happens in-kernel (half the HBM read bytes)
    out_b = out_l.astype(jnp.bfloat16)
    tgt_b = tgt_l.astype(jnp.bfloat16)
    loss_b = manual_multitask_loss(out_b, tgt_b)
    jax.block_until_ready(loss_b)
    ref_b = _reference_loss(out_b, tgt_b)
    assert jnp.allclose(loss_b, ref_b, rtol=1e-3, atol=1e-4), (loss_b, ref_b)

    print("KERNEL_OK")
</pallas_src>

<mosaic_0001>
module attributes {stable_mosaic.version = 11 : i64} {
  func.func @_loss_kernel(%arg0: i32, %arg1: i32, %arg2: memref<8x512xf32, #tpu.memory_space<vmem>>, %arg3: memref<8x512xf32, #tpu.memory_space<vmem>>, %arg4: memref<1x8x512xf32, #tpu.memory_space<vmem>>) attributes {dimension_semantics = [#tpu.dimension_semantics<parallel>, #tpu.dimension_semantics<arbitrary>], iteration_bounds = array<i64: 2, 1>, scalar_prefetch = 0 : i64, scratch_operands = 0 : i64, tpu.core_type = #tpu.core_type<tc>, window_params = [{transform_indices = @transform_0, window_bounds = array<i64: 8, 512>}, {transform_indices = @transform_1, window_bounds = array<i64: 8, 512>}, {transform_indices = @transform_2, window_bounds = array<i64: 1, 8, 512>}]} {
    %c0_i32 = arith.constant 0 : i32
    %0 = arith.cmpi eq, %arg1, %c0_i32 : i32
    %1 = arith.extui %0 : i1 to i32
    %c0_i32_0 = arith.constant 0 : i32
    %2 = arith.cmpi ne, %1, %c0_i32_0 : i32
    scf.if %2 {
      %cst_16 = arith.constant 0.000000e+00 : f32
      %31 = vector.broadcast %cst_16 : f32 to vector<1x8x512xf32>
      %c0_17 = arith.constant 0 : index
      %c0_18 = arith.constant 0 : index
      %c0_19 = arith.constant 0 : index
      %32 = vector.load %arg4[%c0_17, %c0_18, %c0_19] : memref<1x8x512xf32, #tpu.memory_space<vmem>>, vector<1x8x512xf32>
      tpu.vector_store %arg4[%c0_17, %c0_18, %c0_19], %31 {strides = array<i32>} : memref<1x8x512xf32, #tpu.memory_space<vmem>>, vector<1x8x512xf32>,
    } else {
    }
    %c0 = arith.constant 0 : index
    %c0_1 = arith.constant 0 : index
    %3 = vector.load %arg2[%c0, %c0_1] : memref<8x512xf32, #tpu.memory_space<vmem>>, vector<8x512xf32>
    %c0_2 = arith.constant 0 : index
    %c0_3 = arith.constant 0 : index
    %4 = vector.load %arg3[%c0_2, %c0_3] : memref<8x512xf32, #tpu.memory_space<vmem>>, vector<8x512xf32>
    %5 = arith.subf %3, %4 : vector<8x512xf32>
    %6 = math.absf %5 : vector<8x512xf32>
    %7 = arith.mulf %5, %5 : vector<8x512xf32>
    %cst = arith.constant 1.000000e+00 : f32
    %8 = vector.broadcast %cst : f32 to vector<8x512xf32>
    %9 = arith.cmpf olt, %6, %8 : vector<8x512xf32>
    %cst_4 = arith.constant 5.000000e-01 : f32
    %10 = vector.broadcast %cst_4 : f32 to vector<8x512xf32>
    %11 = arith.mulf %10, %7 : vector<8x512xf32>
    %cst_5 = arith.constant 5.000000e-01 : f32
    %12 = vector.broadcast %cst_5 : f32 to vector<8x512xf32>
    %13 = arith.subf %6, %12 : vector<8x512xf32>
    %14 = arith.select %9, %11, %13 : vector<8x512xi1>, vector<8x512xf32>
    %15 = tpu.iota {dimensions = array<i32: 1>} : vector<8x512xi32>
    %c1_i32 = arith.constant 1 : i32
    %16 = vector.broadcast %c1_i32 : i32 to vector<8x512xi32>
    %17 = arith.andi %15, %16 : vector<8x512xi32>
    %c0_i32_6 = arith.constant 0 : i32
    %18 = vector.broadcast %c0_i32_6 : i32 to vector<8x512xi32>
    %19 = arith.cmpi eq, %17, %18 : vector<8x512xi32>
    %cst_7 = arith.constant 7.000000e+00 : f32
    %20 = vector.broadcast %cst_7 : f32 to vector<8x512xf32>
    %21 = arith.mulf %20, %14 : vector<8x512xf32>
    %cst_8 = arith.constant 1.000000e+00 : f32
    %22 = vector.broadcast %cst_8 : f32 to vector<8x512xf32>
    %23 = arith.mulf %22, %7 : vector<8x512xf32>
    %24 = arith.select %19, %21, %23 : vector<8x512xi1>, vector<8x512xf32>
    %25 = vector.shape_cast %24 : vector<8x512xf32> to vector<1x8x512xf32>
    %cst_9 = arith.constant dense<0.000000e+00> : vector<8x512xf32>
    %26 = vector.multi_reduction <add>, %25, %cst_9 [0] : vector<1x8x512xf32> to vector<8x512xf32>
    %c0_10 = arith.constant 0 : index
    %c0_11 = arith.constant 0 : index
    %c0_12 = arith.constant 0 : index
    %27 = vector.load %arg4[%c0_10, %c0_11, %c0_12] : memref<1x8x512xf32, #tpu.memory_space<vmem>>, vector<1x8x512xf32>
    %28 = vector.shape_cast %26 : vector<8x512xf32> to vector<1x8x512xf32>
    %29 = arith.addf %27, %28 : vector<1x8x512xf32>
    %c0_13 = arith.constant 0 : index
    %c0_14 = arith.constant 0 : index
    %c0_15 = arith.constant 0 : index
    %30 = vector.load %arg4[%c0_13, %c0_14, %c0_15] : memref<1x8x512xf32, #tpu.memory_space<vmem>>, vector<1x8x512xf32>
    tpu.vector_store %arg4[%c0_13, %c0_14, %c0_15], %29 {strides = array<i32>} : memref<1x8x512xf32, #tpu.memory_space<vmem>>, vector<1x8x512xf32>,
    return
  }
  func.func @transform_0(%arg0: i32, %arg1: i32) -> (i32, i32) {
    %c1_i32 = arith.constant 1 : i32
    %0 = arith.muli %arg0, %c1_i32 : i32
    %1 = arith.addi %0, %arg1 : i32
    %c0_i32 = arith.constant 0 : i32
    %c0_i32_0 = arith.constant 0 : i32
    return %1, %c0_i32 : i32, i32
  }
  func.func @transform_1(%arg0: i32, %arg1: i32) -> (i32, i32) {
    %c1_i32 = arith.constant 1 : i32
    %0 = arith.muli %arg0, %c1_i32 : i32
    %1 = arith.addi %0, %arg1 : i32
    %c0_i32 = arith.constant 0 : i32
    %c0_i32_0 = arith.constant 0 : i32
    return %1, %c0_i32 : i32, i32
  }
  func.func @transform_2(%arg0: i32, %arg1: i32) -> (i32, i32, i32) {
    %c0_i32 = arith.constant 0 : i32
    %c0_i32_0 = arith.constant 0 : i32
    %c0_i32_1 = arith.constant 0 : i32
    return %arg0, %c0_i32, %c0_i32_0 : i32, i32, i32
  }
}

</mosaic_0001>

<bundles_post_ra>
// kernel: tpu_custom_call.1
= control target key start
LH: loop header
LB: loop body
LE: loop exit
PB: predicated region body
PF: predicated region fallthrough
CT: control target
= control target key end

     0   :  { %7 = vsyncpa [#allocation3], 0  ;;  %s837_s0 = inlined_call_operand.hbm [shape: f32[16,512], index: 0, kind: input, shape index: {}]   ;;  %s838_s1 = inlined_call_operand.hbm [shape: f32[16,512], index: 1, kind: input, shape index: {}]   ;;  %s839_s2 = inlined_call_operand.hbm [shape: f32[2,8,512], index: 2, kind: output, shape index: {}]  }
   0x1   :  { %9 = vsyncpa [#allocation3 + $0x1], 0 }
   0x2   :  { %10 = vsyncpa [#allocation6], 0 }
   0x3   :  { %12 = vsyncpa [#allocation6 + $0x1], 0 }
   0x4   :  { %13 = vsyncpa [#allocation4], 0 }
   0x5   :  { %15 = vsyncpa [#allocation4 + $0x1], 0  ;;  %s680_s9 = smov 0   ;;  %s682_s10 = smov 0  }
   0x6   :  { %s684_s11 = smov 0   ;;  %s686_s12 = smov 0  }
   0x7   :  { %s688_s13 = smov 0   ;;  %s690_s14 = smov 0  }
   0x8 LB: > { %s423_s15 = sadd.s32 4294967295, %s663_s14   ;;  %s424_s16 = sadd.s32 4294967294, %s663_s14   ;;  %s663_s14 = sphi %s690_s14, %s21_s14   ;;  %s659_s13 = sphi %s688_s13, %s856_s13   ;;  %s655_s12 = sphi %s686_s12, %s855_s12   ;;  %s651_s11 = sphi %s684_s11, %s854_s11   ;;  %s647_s10 = sphi %s682_s10, %s853_s10   ;;  %s643_s9 = sphi %s680_s9, %s852_s9  }
   0x9   : > { %s33_s17 = sadd.s32 1, %s659_s13  ;;  %s42_s18 = sadd.s32 1, %s651_s11 }
   0xa   : > { %p35_p0 = scmp.ge.s32.totalorder %s33_s17, 2  ;;  %p49_p1 = scmp.ne.s32.totalorder %s651_s11, %s647_s10 }
   0xb   : > { %p50_p2 = scmp.eq.s32.totalorder %s663_s14, 0  ;;  %p55_p3 = scmp.ne.s32.totalorder %s647_s10, %s643_s9 }
   0xc   : > { %s858_s17 = smov (%p35_p0, %s33_s17), 0  ;;  %p56_p5 = scmp.eq.s32.totalorder %s423_s15, 0 }
   0xd   : > { %p721_p4 = por %p50_p2, %p49_p1  ;;  %s39_s20 = ssub.s32 %s659_s13, %s858_s17 }
   0xe   : > { %p107_p6 = scmp.eq.s32.totalorder %s423_s15, 1  ;;  %p40_p7 = scmp.eq.s32.totalorder %s39_s20, 0 }
   0xf   : > { %p727_p8 = por %p56_p5, %p55_p3  ;;  %p113_p10 = scmp.eq.s32.totalorder %s424_s16, 1 }
  0x10   : > { %p731_p9 = por %p107_p6, %p49_p1  ;;  %p426_p12 = scmp.ge.s32.totalorder %s663_s14, 2 }
  0x11   : > { %s736_s23 = scalar_select %p40_p7, %s651_s11, %s42_s18  }
  0x12   : > { %p738_p11 = por %p113_p10, %p55_p3  ;;  %p466_p13 = scmp.lt.s32.totalorder %s663_s14, 2 }
  0x13   : > { %s133_s25 = sand.u32 1, %s651_s11   ;;  %s446_s27 = sshll.u32 %s659_s13, 5 }
  0x14   : > { %s427_s26 = sshll.u32 %s133_s25, 5  ;;  %s143_s30 = scalar_lea.hbm %s837_s0, %s446_s27 }
  0x15   : > { %s137_s3 = scalar_lea.vmem [#allocation2], %s427_s26  ;;  %s145_s5 = sshll.u32 %s143_s30, 4  ;;  %s146_s5 = int_to_ptr.hbm [resolvable:$true] %s145_s5 }
  0x16   : > { %s147_s4 = sshll.u32 %s137_s3, 4  ;;  %p456_p0 = pnand %p466_p13, %p721_p4  ;;  %s148_s4 = int_to_ptr.vmem [resolvable:$true] %s147_s4 }
  0x17   : > { %p433_p1 = scmp.ge.s32.totalorder %s663_s14, 1  ;;  %p173_p2 = scmp.lt.s32.totalorder %s663_s14, 3 }
  0x18   : > { %s134_s6 = scalar_lea.sflag [#allocation3], %s133_s25  ;;  %s164_s15 = scalar_lea.hbm %s838_s1, %s446_s27 }
  0x19   : > { %458 = dma.hbm_to_vmem [thread:$0]  (!%p456_p0), %s146_s5, 512, %s148_s4, %s134_s6  }
  0x1a   : > { %p174_p3 = pnand %p433_p1, %p173_p2  ;;  %s158_s16 = scalar_lea.vmem [#allocation5], %s427_s26 }
  0x1b   : > { %s168_s18 = sshll.u32 %s158_s16, 4  ;;  %s166_s20 = sshll.u32 %s164_s15, 4  ;;  %s169_s18 = int_to_ptr.vmem [resolvable:$true] %s168_s18  ;;  %s167_s20 = int_to_ptr.hbm [resolvable:$true] %s166_s20 }
  0x1c   : > { %s155_s28 = scalar_lea.sflag [#allocation6], %s133_s25  ;;  %177 = sbr.rel (%p174_p3) target bundleno = 57 (0x39), region = 28 }
  0x1d   : > { %461 = dma.hbm_to_vmem [thread:$0]  (!%p456_p0), %s167_s20, 512, %s169_s18, %s155_s28  }
  0x1e   : > { %s757_s19 = sand.u32 (!%p174_p3), 1, %s647_s10  }
  0x1f   : > { %s760_s29 = sshll.u32 (!%p174_p3), %s757_s19, 5  ;;  %s180_s30 = scalar_lea.sflag (!%p174_p3), [#allocation3], %s757_s19 }
  0x20   : > { %s183_s3 = scalar_lea.vmem (!%p174_p3), [#allocation2], %s760_s29 }
  0x21   : > { %630 = dma.done.wait (%p727_p8), %s180_s30, 512  }
  0x22   : > { %632 = vsyncadd (%p727_p8), %s180_s30, 4294966784  ;;  %s190_s25 = scalar_lea.sflag [#allocation6], %s757_s19  ;;  %s193_s26 = scalar_lea.vmem [#allocation5], %s760_s29 }
  0x23   : > { %634 = dma.done.wait (%p727_p8), %s190_s25, 512  }
  0x24   : > { %636 = vsyncadd (%p727_p8), %s190_s25, 4294966784  ;;  %v266_v0 = vlaneseq  ;;  %v230_v7 = vld [vmem:[%s183_s3] sm:$0xff]  ;;  %v231_v9 = vld [vmem:[%s183_s3 + $0x8] sm:$0xff]  ;;  %s448_s21 = sshll.u32 %s655_s12, 5  ;;  %s219_s5 = scalar_lea.vmem [#allocation7], %s760_s29 }
  0x25   : > { %v234_v8 = vld [vmem:[%s193_s26] sm:$0xff]  ;;  %v235_v12 = vld [vmem:[%s193_s26 + $0x8] sm:$0xff]  ;;  %v232_v13 = vld [vmem:[%s183_s3 + $0x10] sm:$0xff]  ;;  %s315_s4 = scalar_lea.hbm %s839_s2, %s448_s21  ;;  %s317_s6 = sshll.u32 %s219_s5, 4  ;;  %s318_s6 = int_to_ptr.vmem [resolvable:$true] %s317_s6 }
  0x26   : > { %v267_v1 = vand.u32 127, %v266_v0  ;;  %v238_v10 = vsub.f32 %v230_v7, %v234_v8  ;;  %v236_v14 = vld [vmem:[%s193_s26 + $0x10] sm:$0xff]  ;;  %v239_v15 = vsub.f32 %v231_v9, %v235_v12  ;;  %v233_v18 = vld [vmem:[%s183_s3 + $0x18] sm:$0xff]  ;;  %s319_s7 = sshll.u32 %s315_s4, 4  ;;  %s304_s8 = scalar_lea.sflag [#allocation4], %s757_s19  ;;  %s320_s7 = int_to_ptr.hbm [resolvable:$true] %s319_s7 }
  0x27   : > { %v240_v16 = vsub.f32 %v232_v13, %v236_v14  ;;  %v237_v19 = vld [vmem:[%s193_s26 + $0x18] sm:$0xff]  ;;  %s591_s15 = sshra.s32 %s320_s7, 4  ;;  %s597_s28 = scalar_lea.hbm %s839_s2, 64  ;;  %s592_s15 = int_to_ptr.hbm [resolvable:$true] %s591_s15 }
  0x28   : > { %v271_v2 = vand.u32 1, %v267_v1  ;;  %v268_v3 = vadd.s32 128, %v267_v1  ;;  %v269_v4 = vadd.s32 256, %v267_v1  ;;  %v270_v5 = vadd.s32 384, %v267_v1  ;;  %s593_s16 = scalar_lea.hbm %s592_s15, 32  ;;  %p598_p7 = scmp.lt.s32.totalorder %s592_s15, %s839_s2 }
  0x29   : > { %v242_v21 = vand.u32 2147483647, %v238_v10  ;;  %v246_v22 = vmul.f32 %v238_v10, %v238_v10  ;;  %v241_v24 = vsub.f32 %v233_v18, %v237_v19  ;;  %v243_v25 = vand.u32 2147483647, %v239_v15  ;;  %p594_p4 = scmp.ne.s32.totalorder %s592_s15, %s593_s16  ;;  %p599_p8 = scmp.lt.s32.totalorder %s597_s28, %s593_s16 }
  0x2a   : > { %v272_v6 = vand.u32 1, %v268_v3  ;;  %vm774_vm0 = vcmp.eq.s32.totalorder %v271_v2, 0  ;;  %v273_v17 = vand.u32 1, %v269_v4  ;;  %v274_v20 = vand.u32 1, %v270_v5 }
  0x2b   : > { %v247_v26 = vmul.f32 %v239_v15, %v239_v15  ;;  %v244_v27 = vand.u32 2147483647, %v240_v16  ;;  %v248_v28 = vmul.f32 %v240_v16, %v240_v16  ;;  %vm250_vm2 = vcmp.lt.f32.partialorder %v242_v21, 1.0  ;;  %p595_p5 = pnand %p594_p4, %p731_p9  ;;  %p600_p10 = por %p599_p8, %p598_p7 }
  0x2c   : > { %vm778_vm1 = vcmp.eq.s32.totalorder %v272_v6, 0  ;;  %v254_v29 = vmul.f32 0.5, %v246_v22  ;;  %v437_v30 = vadd.f32 -0.5, %v242_v21  ;;  %v245_v31 = vand.u32 2147483647, %v241_v24 }
  0x2d   : > { %vm251_vm3 = vcmp.lt.f32.partialorder %v243_v25, 1.0  ;;  %v255_v32 = vmul.f32 0.5, %v247_v26  ;;  %v438_v33 = vadd.f32 -0.5, %v243_v25  ;;  %vm782_vm4 = vcmp.lt.f32.partialorder %v244_v27, 1.0  ;;  %p596_p6 = pneg %p595_p5 }
  0x2e   : > { %v262_v35 = vsel %vm250_vm2, %v254_v29, %v437_v30  ;;  %v256_v36 = vmul.f32 0.5, %v248_v28  ;;  %v439_v37 = vadd.f32 -0.5, %v244_v27  ;;  %v249_v38 = vmul.f32 %v241_v24, %v241_v24 }
  0x2f   : > { %v279_v39 = vmul.f32 7.0, %v262_v35  ;;  %v263_v40 = vsel %vm251_vm3, %v255_v32, %v438_v33  ;;  %vm253_vm5 = vcmp.lt.f32.partialorder %v245_v31, 1.0  ;;  %v440_v41 = vadd.f32 -0.5, %v245_v31  ;;  %p601_p13 = pnand %p600_p10, %p596_p6 }
  0x30   : > { %v280_v42 = vmul.f32 7.0, %v263_v40  ;;  %v264_v43 = vsel %vm782_vm4, %v256_v36, %v439_v37  ;;  %vm789_vm6 = vcmp.eq.s32.totalorder %v273_v17, 0  ;;  %v257_v45 = vmul.f32 0.5, %v249_v38 }
  0x31   : > { %v283_v46 = vsel %vm774_vm0, %v279_v39, %v246_v22  ;;  %v281_v47 = vmul.f32 7.0, %v264_v43  ;;  %vm278_vm7 = vcmp.eq.s32.totalorder %v274_v20, 0 }
  0x32   : > { %v284_v48 = vsel %vm778_vm1, %v280_v42, %v247_v26  ;;  %v265_v49 = vsel %vm253_vm5, %v257_v45, %v440_v41  ;;  %299 = vst [vmem:[%s219_s5] sm:$0xff] %v283_v46 }
  0x33   : > { %v285_v50 = vsel %vm789_vm6, %v281_v47, %v248_v28  ;;  %v282_v51 = vmul.f32 7.0, %v265_v49  ;;  %300 = vst [vmem:[%s219_s5 + $0x8] sm:$0xff] %v284_v48 }
  0x34   : > { %301 = vst [vmem:[%s219_s5 + $0x10] sm:$0xff] %v285_v50 }
  0x35   : > { %v286_v52 = vsel %vm278_vm7, %v282_v51, %v249_v38 }
  0x36   : > { %302 = vst [vmem:[%s219_s5 + $0x18] sm:$0xff] %v286_v52 }
  0x37   : > { %604 = shalt.err (!%p601_p13)
}
  0x38   : > { %453 = dma.vmem_to_hbm [thread:$0]  (%p731_p9), %s318_s6, 512, %s320_s7, %s304_s8  }
  0x39 PF: > { %s331_s19 = sand.u32 1, %s643_s9   ;;  %p463_p0 = pnand %p426_p12, %p738_p11 }
  0x3a   : > { %s332_s3 = scalar_lea.sflag [#allocation4], %s331_s19 }
  0x3b   : > { %p464_p1 = pneg %p463_p0 }
  0x3d   : > { %638 = dma.done.wait (%p464_p1), %s332_s3, 512  }
  0x3e   : > { %640 = vsyncadd (%p464_p1), %s332_s3, 4294966784  ;;  %s21_s14 = sadd.s32 1, %s663_s14   ;;  %s852_s9 = smov %s647_s10 }
  0x3f   : > { %p18_p2 = scmp.ge.s32.totalorder %s21_s14, 4   ;;  %s853_s10 = smov %s651_s11 }
  0x40   : > { %s854_s11 = smov %s736_s23  ;;  %s855_s12 = smov %s659_s13 }
  0x41   : > { %s856_s13 = smov %s858_s17  ;;  %20 = sbr.rel (!%p18_p2) target bundleno = 8 (0x8), region = 90 }
  0x46   :  { %338 = vsyncpa [#allocation3], 1 }
  0x47   :  { %340 = vsyncpa [#allocation3 + $0x1], 1 }
  0x48   :  { %341 = vsyncpa [#allocation6], 1 }
  0x49   :  { %343 = vsyncpa [#allocation6 + $0x1], 1 }
  0x4a   :  { %344 = vsyncpa [#allocation4], 1 }
  0x4b   :  { %346 = vsyncpa [#allocation4 + $0x1], 1 }

</bundles_post_ra>
